<compile_context>
chip_gen: v5e
topology: v5e:2x2
jax: 0.10.0
libtpu: 0.0.40
codegen_flags: <defaults>
</compile_context>

<pallas_src>
import jax
import jax.numpy as jnp
from jax import lax
from jax.experimental import pallas as pl
from jax.experimental.pallas import tpu as pltpu


def _complex_linear_bias_kernel(xr_ref, xi_ref, w_ref, b_ref, or_ref, oi_ref):
    in_f = xr_ref.shape[1]
    out_f = or_ref.shape[1]
    # Contract x dim 1 with weight dim 1  ==  x @ W_half.T  (no transpose in HBM).
    dn = (((1,), (1,)), ((), ()))
    acc = lax.dot_general(xr_ref[...], w_ref[:, :in_f], dn,
                          preferred_element_type=jnp.float32)
    acc = acc + lax.dot_general(xi_ref[...], w_ref[:, in_f:], dn,
                                preferred_element_type=jnp.float32)
    acc = acc + b_ref[...].astype(jnp.float32)          # (1, 2*out) broadcast
    or_ref[...] = acc[:, :out_f].astype(or_ref.dtype)
    oi_ref[...] = acc[:, out_f:].astype(oi_ref.dtype)


def _complex_linear_nobias_kernel(xr_ref, xi_ref, w_ref, or_ref, oi_ref):
    in_f = xr_ref.shape[1]
    out_f = or_ref.shape[1]
    dn = (((1,), (1,)), ((), ()))
    acc = lax.dot_general(xr_ref[...], w_ref[:, :in_f], dn,
                          preferred_element_type=jnp.float32)
    acc = acc + lax.dot_general(xi_ref[...], w_ref[:, in_f:], dn,
                                preferred_element_type=jnp.float32)
    or_ref[...] = acc[:, :out_f].astype(or_ref.dtype)
    oi_ref[...] = acc[:, out_f:].astype(oi_ref.dtype)


def _pick_tile_m(m_pad, max_tile=512):
    """Largest multiple-of-8 divisor of m_pad that is <= max_tile."""
    best = 8
    for cand in range(8, min(max_tile, m_pad) + 1, 8):
        if m_pad % cand == 0:
            best = cand
    return best


def complex_linear(x, weight, bias=None):
    """x: complex (..., in); weight: real (2*out, 2*in); bias: real (2*out,) or None."""
    *lead, in_features = x.shape
    out2, in2 = weight.shape
    assert in2 == 2 * in_features
    out_features = out2 // 2
    dt = weight.dtype

    m = 1
    for d in lead:
        m *= d

    # Unavoidable glue: pull real/imag planes out of the complex array.
    x_r = jnp.real(x).reshape(m, in_features).astype(dt)
    x_i = jnp.imag(x).reshape(m, in_features).astype(dt)

    # Pad rows to a multiple of 8 (sublane) so an exact M grid exists.
    m_pad = ((m + 7) // 8) * 8
    if m_pad != m:
        pad = ((0, m_pad - m), (0, 0))
        x_r = jnp.pad(x_r, pad)
        x_i = jnp.pad(x_i, pad)

    tile_m = _pick_tile_m(m_pad)
    grid = (m_pad // tile_m,)

    in_specs = [
        pl.BlockSpec((tile_m, in_features), lambda i: (i, 0)),   # x_r tile
        pl.BlockSpec((tile_m, in_features), lambda i: (i, 0)),   # x_i tile
        pl.BlockSpec((out2, in2), lambda i: (0, 0)),             # weight, VMEM-resident
    ]
    out_specs = (
        pl.BlockSpec((tile_m, out_features), lambda i: (i, 0)),  # y_real
        pl.BlockSpec((tile_m, out_features), lambda i: (i, 0)),  # y_imag
    )
    out_shape = (
        jax.ShapeDtypeStruct((m_pad, out_features), dt),
        jax.ShapeDtypeStruct((m_pad, out_features), dt),
    )
    cparams = pltpu.CompilerParams(dimension_semantics=("parallel",))

    if bias is not None:
        b = bias.reshape(1, out2).astype(dt)
        in_specs = in_specs + [pl.BlockSpec((1, out2), lambda i: (0, 0))]
        y_r, y_i = pl.pallas_call(
            _complex_linear_bias_kernel,
            grid=grid,
            in_specs=in_specs,
            out_specs=out_specs,
            out_shape=out_shape,
            compiler_params=cparams,
        )(x_r, x_i, weight, b)
    else:
        y_r, y_i = pl.pallas_call(
            _complex_linear_nobias_kernel,
            grid=grid,
            in_specs=in_specs,
            out_specs=out_specs,
            out_shape=out_shape,
            compiler_params=cparams,
        )(x_r, x_i, weight)

    if m_pad != m:
        y_r = y_r[:m]
        y_i = y_i[:m]

    out = lax.complex(y_r, y_i)  # complex64 for f32 weights
    return out.reshape(*lead, out_features)


if __name__ == "__main__":
    # Module config (dtype=torch.complex64 -> float32 weights)
    in_features = 32
    out_features = 32

    # Deterministic parameters matching the module's __init__:
    #   weight = ones((2*out, 2*in), float32), bias = zeros((2*out,), float32)
    weight = jnp.ones((2 * out_features, 2 * in_features), dtype=jnp.float32)
    bias = jnp.zeros((2 * out_features,), dtype=jnp.float32)

    # Deterministic complex input: (batch=2, seq=8, in_features=32)
    key = jax.random.PRNGKey(0)
    kr, ki = jax.random.split(key)
    x_r = jax.random.normal(kr, (2, 8, in_features), dtype=jnp.float32)
    x_i = jax.random.normal(ki, (2, 8, in_features), dtype=jnp.float32)
    x = lax.complex(x_r, x_i)  # complex64

    # --- bias path ---
    out = complex_linear(x, weight, bias)
    out = jax.block_until_ready(out)

    x_cat = jnp.concatenate([x_r, x_i], axis=-1)
    y_ref = x_cat @ weight.T + bias
    ref = lax.complex(y_ref[..., :out_features], y_ref[..., out_features:])

    assert out.shape == (2, 8, out_features), out.shape
    assert out.dtype == jnp.complex64, out.dtype
    assert jnp.allclose(out, ref, rtol=1e-5, atol=1e-5)

    # --- bias=None path (specialized kernel) ---
    out_nb = complex_linear(x, weight, None)
    out_nb = jax.block_until_ready(out_nb)
    y_ref_nb = x_cat @ weight.T
    ref_nb = lax.complex(y_ref_nb[..., :out_features], y_ref_nb[..., out_features:])
    assert jnp.allclose(out_nb, ref_nb, rtol=1e-5, atol=1e-5)

    print("KERNEL_OK")
</pallas_src>

<mosaic_0001>
module attributes {stable_mosaic.version = 11 : i64} {
  func.func @_complex_linear_bias_kernel(%arg0: i32, %arg1: memref<16x32xf32, #tpu.memory_space<vmem>>, %arg2: memref<16x32xf32, #tpu.memory_space<vmem>>, %arg3: memref<64x64xf32, #tpu.memory_space<vmem>>, %arg4: memref<1x64xf32, #tpu.memory_space<vmem>>, %arg5: memref<16x32xf32, #tpu.memory_space<vmem>>, %arg6: memref<16x32xf32, #tpu.memory_space<vmem>>) attributes {dimension_semantics = [#tpu.dimension_semantics<parallel>], iteration_bounds = array<i64: 1>, scalar_prefetch = 0 : i64, scratch_operands = 0 : i64, tpu.core_type = #tpu.core_type<tc>, window_params = [{transform_indices = @transform_0, window_bounds = array<i64: 16, 32>}, {transform_indices = @transform_1, window_bounds = array<i64: 16, 32>}, {pipeline_mode = #tpu.pipeline_mode<synchronous>, transform_indices = @transform_2, window_bounds = array<i64: 64, 64>}, {pipeline_mode = #tpu.pipeline_mode<synchronous>, transform_indices = @transform_3, window_bounds = array<i64: 1, 64>}, {transform_indices = @transform_4, window_bounds = array<i64: 16, 32>}, {transform_indices = @transform_5, window_bounds = array<i64: 16, 32>}]} {
    %c0 = arith.constant 0 : index
    %c0_0 = arith.constant 0 : index
    %0 = vector.load %arg1[%c0, %c0_0] : memref<16x32xf32, #tpu.memory_space<vmem>>, vector<16x32xf32>
    %c0_1 = arith.constant 0 : index
    %c0_2 = arith.constant 0 : index
    %1 = vector.load %arg3[%c0_1, %c0_2] : memref<64x64xf32, #tpu.memory_space<vmem>>, vector<64x32xf32>
    %cst = arith.constant dense<0.000000e+00> : vector<16x64xf32>
    %2 = tpu.matmul %0, %1, %cst {dimension_numbers = #tpu.dot_dimension_numbers<[1], [1], [0], [0], [0, 0, 1, 0], [], []>} : vector<16x32xf32>, vector<64x32xf32>, vector<16x64xf32> -> vector<16x64xf32>
    %c0_3 = arith.constant 0 : index
    %c0_4 = arith.constant 0 : index
    %3 = vector.load %arg2[%c0_3, %c0_4] : memref<16x32xf32, #tpu.memory_space<vmem>>, vector<16x32xf32>
    %c0_5 = arith.constant 0 : index
    %c32 = arith.constant 32 : index
    %4 = vector.load %arg3[%c0_5, %c32] : memref<64x64xf32, #tpu.memory_space<vmem>>, vector<64x32xf32>
    %cst_6 = arith.constant dense<0.000000e+00> : vector<16x64xf32>
    %5 = tpu.matmul %3, %4, %cst_6 {dimension_numbers = #tpu.dot_dimension_numbers<[1], [1], [0], [0], [0, 0, 1, 0], [], []>} : vector<16x32xf32>, vector<64x32xf32>, vector<16x64xf32> -> vector<16x64xf32>
    %6 = arith.addf %2, %5 : vector<16x64xf32>
    %c0_7 = arith.constant 0 : index
    %c0_8 = arith.constant 0 : index
    %7 = vector.load %arg4[%c0_7, %c0_8] : memref<1x64xf32, #tpu.memory_space<vmem>>, vector<1x64xf32>
    %8 = vector.broadcast %7 : vector<1x64xf32> to vector<16x64xf32>
    %9 = arith.addf %6, %8 : vector<16x64xf32>
    %10 = vector.extract_strided_slice %9 {offsets = [0, 0], sizes = [16, 32], strides = [1, 1]} : vector<16x64xf32> to vector<16x32xf32>
    %c0_9 = arith.constant 0 : index
    %c0_10 = arith.constant 0 : index
    %11 = vector.load %arg5[%c0_9, %c0_10] : memref<16x32xf32, #tpu.memory_space<vmem>>, vector<16x32xf32>
    tpu.vector_store %arg5[%c0_9, %c0_10], %10 {strides = array<i32>} : memref<16x32xf32, #tpu.memory_space<vmem>>, vector<16x32xf32>,
    %12 = vector.extract_strided_slice %9 {offsets = [0, 32], sizes = [16, 32], strides = [1, 1]} : vector<16x64xf32> to vector<16x32xf32>
    %c0_11 = arith.constant 0 : index
    %c0_12 = arith.constant 0 : index
    %13 = vector.load %arg6[%c0_11, %c0_12] : memref<16x32xf32, #tpu.memory_space<vmem>>, vector<16x32xf32>
    tpu.vector_store %arg6[%c0_11, %c0_12], %12 {strides = array<i32>} : memref<16x32xf32, #tpu.memory_space<vmem>>, vector<16x32xf32>,
    return
  }
  func.func @transform_0(%arg0: i32) -> (i32, i32) {
    %c0_i32 = arith.constant 0 : i32
    %c0_i32_0 = arith.constant 0 : i32
    return %arg0, %c0_i32 : i32, i32
  }
  func.func @transform_1(%arg0: i32) -> (i32, i32) {
    %c0_i32 = arith.constant 0 : i32
    %c0_i32_0 = arith.constant 0 : i32
    return %arg0, %c0_i32 : i32, i32
  }
  func.func @transform_2(%arg0: i32) -> (i32, i32) {
    %c0_i32 = arith.constant 0 : i32
    %c0_i32_0 = arith.constant 0 : i32
    %c0_i32_1 = arith.constant 0 : i32
    return %c0_i32, %c0_i32_0 : i32, i32
  }
  func.func @transform_3(%arg0: i32) -> (i32, i32) {
    %c0_i32 = arith.constant 0 : i32
    %c0_i32_0 = arith.constant 0 : i32
    %c0_i32_1 = arith.constant 0 : i32
    return %c0_i32, %c0_i32_0 : i32, i32
  }
  func.func @transform_4(%arg0: i32) -> (i32, i32) {
    %c0_i32 = arith.constant 0 : i32
    %c0_i32_0 = arith.constant 0 : i32
    return %arg0, %c0_i32 : i32, i32
  }
  func.func @transform_5(%arg0: i32) -> (i32, i32) {
    %c0_i32 = arith.constant 0 : i32
    %c0_i32_0 = arith.constant 0 : i32
    return %arg0, %c0_i32 : i32, i32
  }
}

</mosaic_0001>

<bundles_post_ra>
// kernel: tpu_custom_call.1
= control target key start
LH: loop header
LB: loop body
LE: loop exit
PB: predicated region body
PF: predicated region fallthrough
CT: control target
= control target key end

     0   :  { %11 = vsyncpa [#allocation3], 0  ;;  %s545_s0 = inlined_call_operand.hbm [shape: f32[16,32], index: 0, kind: input, shape index: {}]   ;;  %s546_s1 = inlined_call_operand.hbm [shape: f32[16,32], index: 1, kind: input, shape index: {}]   ;;  %s547_s2 = inlined_call_operand.hbm [shape: f32[64,64], index: 2, kind: input, shape index: {}]   ;;  %s548_s3 = inlined_call_operand.vmem [shape: f32[1,64], index: 3, kind: input, shape index: {}]   ;;  %s549_s4 = inlined_call_operand.hbm [shape: f32[16,32], index: 4, kind: output, shape index: {0}]   ;;  %s550_s5 = inlined_call_operand.hbm [shape: f32[16,32], index: 5, kind: output, shape index: {1}]  }
   0x1   :  { %12 = vsyncpa [#allocation6], 0 }
   0x2   :  { %13 = vsyncpa [#allocation4], 0 }
   0x3   :  { %14 = vsyncpa [#allocation10], 0  ;;  %s32_s20 = sshll.u32 %s546_s1, 4  ;;  %s424_s21 = smov [#allocation5]   ;;  %s33_s20 = int_to_ptr.hbm [resolvable:$true] %s32_s20 }
   0x4   :  { %s34_s22 = sshll.u32 %s424_s21, 4  ;;  %s19_s25 = sshll.u32 %s545_s0, 4  ;;  %s35_s22 = int_to_ptr.vmem [resolvable:$true] %s34_s22  ;;  %s20_s25 = int_to_ptr.hbm [resolvable:$true] %s19_s25 }
   0x5   :  { %s425_s26 = smov 128   ;;  %s426_s27 = smov 8  }
   0x6   :  { %40 = dma.hbm_to_vmem [thread:$0]  %s33_s20, 256, %s35_s22, [#allocation6], %s425_s26, %s425_s26, %s426_s27  }
   0x7   :  { %s427_s28 = smov [#allocation2]   ;;  %s45_s1 = sshll.u32 %s547_s2, 4  ;;  %s46_s1 = int_to_ptr.hbm [resolvable:$true] %s45_s1 }
   0x8   :  { %s21_s29 = sshll.u32 %s427_s28, 4  ;;  %s428_s0 = smov [#allocation7]   ;;  %s22_s29 = int_to_ptr.vmem [resolvable:$true] %s21_s29 }
   0x9   :  { %27 = dma.hbm_to_vmem [thread:$0]  %s20_s25, 256, %s22_s29, [#allocation3], %s425_s26, %s425_s26, %s426_s27  }
   0xa   :  { %s47_s7 = sshll.u32 %s428_s0, 4  ;;  %s48_s7 = int_to_ptr.vmem [resolvable:$true] %s47_s7 }
   0xb   :  { %53 = dma.hbm_to_vmem [thread:$0]  %s46_s1, 1024, %s48_s7, [#allocation6], %s425_s26, %s425_s26, %s426_s27  }
   0xc   :  { %416 = dma.done.wait [#allocation3], 256  }
   0xd   :  { %417 = vsyncadd [#allocation3], 4294967040 }
   0xe   :  { %418 = dma.done.wait [#allocation6], 1280  }
   0xf   :  { %419 = vsyncadd [#allocation6], 4294966016  ;;  %v77_v0 = vld [vmem:[#allocation7 + $0x38] sm:$0xff]  ;;  %v75_v1 = vld [vmem:[#allocation7 + $0x28] sm:$0xff]  ;;  %s429_s2 = smov 96   ;;  %vm104_vm0 = vcmask 261120  }
  0x10   :  { %102 = vrot.lane.b32.xlu0 %v77_v0, %s429_s2  ;;  %98 = vrot.lane.b32.xlu1 %v75_v1, %s429_s2  ;;  %v73_v2 = vld [vmem:[#allocation7 + $0x18] sm:$0xff]  ;;  %v76_v3 = vld [vmem:[#allocation7 + $0x30] sm:$0xff]  ;;  %v74_v4 = vld [vmem:[#allocation7 + $0x20] sm:$0xff]  ;;  %s430_s10 = smov [#allocation8]   ;;  %s219_s14 = sshll.u32 %s549_s4, 4  ;;  %s220_s14 = int_to_ptr.hbm [resolvable:$true] %s219_s14 }
  0x11   :  { %94 = vrot.lane.b32.xlu2 %v73_v2, %s429_s2  ;;  %v72_v5 = vld [vmem:[#allocation7 + $0x10] sm:$0xff]  ;;  %v71_v6 = vld [vmem:[#allocation7 + $0x8] sm:$0xff]  ;;  %v70_v7 = vld [vmem:[#allocation7] sm:$0xff]  ;;  %279 = vmatpush.xpose.msk.msra.mxu3 %vm104_vm0, %v77_v0  ;;  %s217_s11 = sshll.u32 %s430_s10, 4  ;;  %s232_s4 = sshll.u32 %s550_s5, 4  ;;  %s218_s11 = int_to_ptr.vmem [resolvable:$true] %s217_s11  ;;  %s233_s4 = int_to_ptr.hbm [resolvable:$true] %s232_s4 }
  0x12   :  { %261 = vmatpush.xpose.msk.msra.mxu1 %vm104_vm0, %v77_v0  ;;  %v69_v9 = vld [vmem:[#allocation2 + $0x8] sm:$0xff]  ;;  %v68_v11 = vld [vmem:[#allocation2] sm:$0xff]  ;;  %v79_v18 = vld [vmem:[#allocation5 + $0x8] sm:$0xff] }
  0x13   :  { %v78_v19 = vld [vmem:[#allocation5] sm:$0xff]  ;;  %v295_v22 = vld [vmem:[%s548_s3] ss:$0 sm:$0xff]  ;;  %s431_s3 = smov [#allocation9]  }
  0x14   :  { %s230_s15 = sshll.u32 %s431_s3, 4  ;;  %s231_s15 = int_to_ptr.vmem [resolvable:$true] %s230_s15 }
  0x15   :  { %280 = vmatpush.xpose.msk.msra.mxu3 %vm104_vm0, %v76_v3 }
  0x16   :  { %262 = vmatpush.xpose.msk.msra.mxu1 %vm104_vm0, %v76_v3 }
  0x18   :  { %100 = vrot.lane.b32.xlu0 %v76_v3, %s429_s2  ;;  %96 = vrot.lane.b32.xlu1 %v74_v4, %s429_s2 }
  0x19   :  { %92 = vrot.lane.b32.xlu2 %v72_v5, %s429_s2  ;;  %281 = vmatpush.xpose.msk.msra.mxu3 %vm104_vm0, %v75_v1 }
  0x1a   :  { %263 = vmatpush.xpose.msk.msra.mxu1 %vm104_vm0, %v75_v1 }
  0x1d   :  { %282 = vmatpush.xpose.msk.msra.mxu3 %vm104_vm0, %v74_v4 }
  0x1e   :  { %264 = vmatpush.xpose.msk.msra.mxu1 %vm104_vm0, %v74_v4 }
  0x20   :  { %90 = vrot.lane.b32.xlu0 %v71_v6, %s429_s2  ;;  %88 = vrot.lane.b32.xlu1 %v70_v7, %s429_s2 }
  0x21   :  { %283 = vmatpush.xpose.msk.msra.mxu3 %vm104_vm0, %v73_v2 }
  0x22   :  { %265 = vmatpush.xpose.msk.msra.mxu1 %vm104_vm0, %v73_v2 }
  0x25   :  { %284 = vmatpush.xpose.msk.msra.mxu3 %vm104_vm0, %v72_v5 }
  0x26   :  { %266 = vmatpush.xpose.msk.msra.mxu1 %vm104_vm0, %v72_v5 }
  0x29   :  { %285 = vmatpush.xpose.msk.msra.mxu3 %vm104_vm0, %v71_v6 }
  0x2a   :  { %267 = vmatpush.xpose.msk.msra.mxu1 %vm104_vm0, %v71_v6 }
  0x2d   :  { %286 = vmatpush.xpose.msk.msra.mxu3 %vm104_vm0, %v70_v7 }
  0x2e   :  { %268 = vmatpush.xpose.msk.msra.mxu1 %vm104_vm0, %v70_v7 }
  0x30   :  { %270 = vmatmul.msk.f32.vlgmr.msra.gmra.mxu3 %vm104_vm0, %v69_v9 }
  0x31   :  { %269 = vmatmul.msk.f32.vlgmr.msra.gmra.mxu1 %vm104_vm0, %v68_v11 }
  0x6b   :  { %v95_v13 = vpop.permute.xlu2 %94 }
  0x73   :  { %v93_v15 = vpop.permute.xlu2 %92 }
  0x82   :  { %v103_v8 = vpop.permute.xlu0 %102  ;;  %v99_v10 = vpop.permute.xlu1 %98 }
  0x83   :  { %251 = vmatpush.xpose.msk.msra.mxu0 %vm104_vm0, %v103_v8  ;;  %271 = vmatpush.xpose.msk.msra.mxu2 %vm104_vm0, %v103_v8 }
  0x8a   :  { %v101_v12 = vpop.permute.xlu0 %100  ;;  %v97_v14 = vpop.permute.xlu1 %96 }
  0x8b   :  { %252 = vmatpush.xpose.msk.msra.mxu0 %vm104_vm0, %v101_v12  ;;  %272 = vmatpush.xpose.msk.msra.mxu2 %vm104_vm0, %v101_v12 }
  0x8f   :  { %253 = vmatpush.xpose.msk.msra.mxu0 %vm104_vm0, %v99_v10  ;;  %273 = vmatpush.xpose.msk.msra.mxu2 %vm104_vm0, %v99_v10 }
  0x92   :  { %v91_v16 = vpop.permute.xlu0 %90  ;;  %v89_v17 = vpop.permute.xlu1 %88 }
  0x93   :  { %254 = vmatpush.xpose.msk.msra.mxu0 %vm104_vm0, %v97_v14  ;;  %274 = vmatpush.xpose.msk.msra.mxu2 %vm104_vm0, %v97_v14 }
  0x97   :  { %255 = vmatpush.xpose.msk.msra.mxu0 %vm104_vm0, %v95_v13  ;;  %275 = vmatpush.xpose.msk.msra.mxu2 %vm104_vm0, %v95_v13 }
  0x9b   :  { %256 = vmatpush.xpose.msk.msra.mxu0 %vm104_vm0, %v93_v15  ;;  %276 = vmatpush.xpose.msk.msra.mxu2 %vm104_vm0, %v93_v15 }
  0x9f   :  { %257 = vmatpush.xpose.msk.msra.mxu0 %vm104_vm0, %v91_v16  ;;  %277 = vmatpush.xpose.msk.msra.mxu2 %vm104_vm0, %v91_v16 }
  0xa3   :  { %258 = vmatpush.xpose.msk.msra.mxu0 %vm104_vm0, %v89_v17  ;;  %278 = vmatpush.xpose.msk.msra.mxu2 %vm104_vm0, %v89_v17 }
  0xa6   :  { %260 = vmatmul.msk.f32.vlgmr.msra.gmra.mxu2 %vm104_vm0, %v79_v18  ;;  %259 = vmatmul.msk.f32.vlgmr.msra.gmra.mxu0 %vm104_vm0, %v78_v19 }
  0xae   :  { %v189_v20 = vpop.f32.mrf.mxu1 }
  0xb3   :  { %v192_v25 = vpop.f32.mrf.mxu3 }
 0x123   :  { %v144_v21 = vpop.f32.mrf.mxu0 }
 0x124   :  { %v190_v23 = vadd.f32 %v189_v20, %v144_v21 }
 0x126   :  { %v199_v24 = vadd.f32 %v295_v22, %v190_v23 }
 0x128   :  { %201 = vst.msk [vmem:[#allocation8] sm:$0xff] %vm104_vm0, %v199_v24  ;;  %205 = vrot.lane.b32.xlu2 %v199_v24, %s429_s2 }
 0x129   :  { %v147_v26 = vpop.f32.mrf.mxu2 }
 0x12a   :  { %v193_v27 = vadd.f32 %v192_v25, %v147_v26 }
 0x12c   :  { %v200_v28 = vadd.f32 %v295_v22, %v193_v27 }
 0x12e   :  { %202 = vst.msk [vmem:[#allocation8 + $0x8] sm:$0xff] %vm104_vm0, %v200_v28  ;;  %207 = vrot.lane.b32.xlu0 %v200_v28, %s429_s2 }
 0x12f   :  { %225 = dma.vmem_to_hbm [thread:$0]  %s218_s11, 256, %s220_s14, [#allocation4], %s425_s26, %s425_s26, %s426_s27  }
 0x182   :  { %v206_v29 = vpop.permute.xlu2 %205 }
 0x183   :  { %211 = vst.msk [vmem:[#allocation9] sm:$0xff] %vm104_vm0, %v206_v29 }
 0x1a0   :  { %v208_v30 = vpop.permute.xlu0 %207 }
 0x1a1   :  { %212 = vst.msk [vmem:[#allocation9 + $0x8] sm:$0xff] %vm104_vm0, %v208_v30 }
 0x1a2   :  { %238 = dma.vmem_to_hbm [thread:$0]  %s231_s15, 256, %s233_s4, [#allocation10], %s425_s26, %s425_s26, %s426_s27  }
 0x1a3   :  { %420 = dma.done.wait [#allocation4], 256  }
 0x1a4   :  { %421 = vsyncadd [#allocation4], 4294967040 }
 0x1a5   :  { %422 = dma.done.wait [#allocation10], 256  }
 0x1a6   :  { %423 = vsyncadd [#allocation10], 4294967040 }
 0x1a7   :  { %247 = vsyncpa [#allocation3], 1 }
 0x1a8   :  { %248 = vsyncpa [#allocation6], 1 }
 0x1a9   :  { %249 = vsyncpa [#allocation4], 1 }
 0x1aa   :  { %250 = vsyncpa [#allocation10], 1 }

</bundles_post_ra>
